<compile_context>
chip_gen: v7x
topology: tpu7x:2x2x1
jax: 0.10.0
libtpu: 0.0.40
codegen_flags: <defaults>
</compile_context>

<pallas_src>
import jax
import jax.numpy as jnp
from jax.experimental import pallas as pl
from jax.experimental.pallas import tpu as pltpu

_MiB = 1024 * 1024


def _round_up(x, m):
    return (x + m - 1) // m * m


def _tpu_generation_info():
    """Per-generation VMEM budget, lane padding and TensorCore count."""
    try:
        kind = jax.devices()[0].device_kind.lower()
    except Exception:  # pragma: no cover - defensive
        kind = ""
    if "v7" in kind or "7x" in kind or "tpu7" in kind:
        # v7x: 64 MiB VMEM per TC -> leave ~12 MiB headroom; 256-wide MXU; 2 TCs.
        return {"vmem_cap": 52 * _MiB, "lane_pad": 256, "cores": 2}
    if "v6" in kind:
        # v6e: 128 MiB physical; 256-wide MXU; 1 TC.
        return {"vmem_cap": 100 * _MiB, "lane_pad": 256, "cores": 1}
    if "v5" in kind or "v4" in kind or "v3" in kind:
        # v5e/v5p/older: 128 MiB physical; 128-wide MXU; 1 TC.
        return {"vmem_cap": 100 * _MiB, "lane_pad": 128, "cores": 1}
    # Unknown generation: size conservatively (v7x-like budget, wide padding).
    return {"vmem_cap": 48 * _MiB, "lane_pad": 256, "cores": 1}


def _pick_tile(dim, preferred, unit):
    """Largest multiple of `unit` that divides `dim` and is <= preferred."""
    best = unit
    t = unit
    limit = min(dim, preferred)
    while t <= limit:
        if dim % t == 0:
            best = t
        t += unit
    return best


# --------------------------------------------------------------------------- #
# Fused path: all layers in one kernel, weights resident in VMEM.
# --------------------------------------------------------------------------- #
def _make_fused_mlp_kernel(n_linear):
    """Ref order: x_ref, (w0, b0, w1, b1, ...), o_ref.

      x_ref : (tile_m, d0p)   bf16
      w_i   : (in_p, out_p)   bf16   (whole array, resident in VMEM)
      b_i   : (1, out_p)      f32
      o_ref : (tile_m, dLp)   f32
    """
    def kernel(*refs):
        x_ref = refs[0]
        o_ref = refs[-1]
        param_refs = refs[1:-1]
        h = x_ref[...]                                   # bf16
        for i in range(n_linear):
            w = param_refs[2 * i][...]                   # bf16 (in_p, out_p)
            b = param_refs[2 * i + 1][...]               # f32  (1, out_p)
            acc = jnp.dot(h, w, preferred_element_type=jnp.float32) + b
            acc = jnp.maximum(acc, 0.0)                  # ReLU after every Linear
            h = acc.astype(jnp.bfloat16) if i < n_linear - 1 else acc
        o_ref[...] = h.astype(o_ref.dtype)
    return kernel


def _fused_mlp_call(x_p, w_pad, b_pad, pdims, tile_m, param_bytes, vmem_cap):
    n_linear = len(w_pad)
    Bp = x_p.shape[0]
    grid = (Bp // tile_m,)

    in_specs = [pl.BlockSpec((tile_m, pdims[0]), lambda i: (i, 0))]
    flat_params = []
    for wp, bp in zip(w_pad, b_pad):
        in_specs.append(pl.BlockSpec(memory_space=pltpu.MemorySpace.VMEM))
        in_specs.append(pl.BlockSpec(memory_space=pltpu.MemorySpace.VMEM))
        flat_params.extend([wp, bp])

    out_spec = pl.BlockSpec((tile_m, pdims[-1]), lambda i: (i, 0))

    io_bytes = 2 * tile_m * pdims[0] * 2 + 2 * tile_m * pdims[-1] * 4
    act_bytes = 4 * tile_m * max(pdims) * 4
    vmem_limit = int(min(max(param_bytes + io_bytes + act_bytes + (4 * _MiB),
                             32 * _MiB),
                         vmem_cap))

    flops = 2 * Bp * sum(pdims[i] * pdims[i + 1] for i in range(n_linear))
    bytes_accessed = param_bytes + int(x_p.size) * 2 + Bp * pdims[-1] * 4

    return pl.pallas_call(
        _make_fused_mlp_kernel(n_linear),
        out_shape=jax.ShapeDtypeStruct((Bp, pdims[-1]), jnp.float32),
        grid=grid,
        in_specs=in_specs,
        out_specs=out_spec,
        compiler_params=pltpu.CompilerParams(
            dimension_semantics=("parallel",),
            vmem_limit_bytes=vmem_limit,
        ),
        cost_estimate=pl.CostEstimate(
            flops=int(flops),
            transcendentals=0,
            bytes_accessed=int(bytes_accessed),
        ),
    )(x_p, *flat_params)


# --------------------------------------------------------------------------- #
# Streaming fallback: one layer per pallas_call, weights tiled over (N, K).
# --------------------------------------------------------------------------- #
def _linear_relu_stream_kernel(x_ref, w_ref, b_ref, o_ref, acc_ref):
    k = pl.program_id(2)

    @pl.when(k == 0)
    def _():
        acc_ref[...] = jnp.zeros_like(acc_ref)

    acc_ref[...] += jnp.dot(x_ref[...], w_ref[...],
                            preferred_element_type=jnp.float32)

    @pl.when(k == pl.num_programs(2) - 1)
    def _():
        o_ref[...] = jnp.maximum(acc_ref[...] + b_ref[...], 0.0).astype(o_ref.dtype)


def _linear_relu_streamed(x, w, b, *, out_dtype, tile_m, lane_pad, vmem_cap):
    M, K = x.shape
    _, N = w.shape
    tm = tile_m
    tk = _pick_tile(K, 512, lane_pad)
    tn = _pick_tile(N, 512, lane_pad)
    grid = (M // tm, N // tn, K // tk)

    out_bytes = jnp.dtype(out_dtype).itemsize
    tile_bytes = (2 * tm * tk * 2 + 2 * tk * tn * 2 + 2 * tn * 4
                  + 2 * tm * tn * out_bytes + tm * tn * 4)
    vmem_limit = int(min(max(tile_bytes + 4 * _MiB, 32 * _MiB), vmem_cap))

    return pl.pallas_call(
        _linear_relu_stream_kernel,
        out_shape=jax.ShapeDtypeStruct((M, N), out_dtype),
        grid=grid,
        in_specs=[
            pl.BlockSpec((tm, tk), lambda i, j, k: (i, k)),
            pl.BlockSpec((tk, tn), lambda i, j, k: (k, j)),
            pl.BlockSpec((1, tn), lambda i, j, k: (0, j)),
        ],
        out_specs=pl.BlockSpec((tm, tn), lambda i, j, k: (i, j)),
        scratch_shapes=[pltpu.VMEM((tm, tn), jnp.float32)],
        compiler_params=pltpu.CompilerParams(
            dimension_semantics=("parallel", "parallel", "arbitrary"),
            vmem_limit_bytes=vmem_limit,
        ),
        cost_estimate=pl.CostEstimate(
            flops=int(2 * M * N * K),
            transcendentals=0,
            bytes_accessed=int(M * K * 2 + K * N * 2 + M * N * out_bytes),
        ),
    )(x, w, b)


# --------------------------------------------------------------------------- #
# Public wrapper
# --------------------------------------------------------------------------- #
def fixed_width_mlp_encoder(x, weights, biases, *, tile_m=512, force_streaming=False):
    """Runs the full MLP encoder as Pallas kernel(s).

    x:       (B, data_dim) float32
    weights: list of (in_i, out_i) float32 arrays (already transposed vs PyTorch)
    biases:  list of (1, out_i) float32 arrays
    """
    assert len(weights) == len(biases)
    n_linear = len(weights)
    B, data_dim = x.shape
    latent_dim = weights[-1].shape[1]

    gen = _tpu_generation_info()
    lane_pad = gen["lane_pad"]
    vmem_cap = gen["vmem_cap"]
    cores = gen["cores"]

    # ---- pad feature dims to the MXU-friendly lane multiple ------------------
    dims = [data_dim] + [w.shape[1] for w in weights]
    pdims = [_round_up(d, lane_pad) for d in dims]

    w_pad, b_pad = [], []
    for i, (w, b) in enumerate(zip(weights, biases)):
        wp = jnp.pad(w, ((0, pdims[i] - w.shape[0]), (0, pdims[i + 1] - w.shape[1])))
        bp = jnp.pad(b, ((0, 0), (0, pdims[i + 1] - b.shape[1])))
        w_pad.append(wp.astype(jnp.bfloat16))
        b_pad.append(bp.astype(jnp.float32))
    param_bytes = sum(int(a.size) * a.dtype.itemsize for a in w_pad + b_pad)

    # ---- choose tile_m --------------------------------------------------------
    tile_m = _round_up(max(1, min(tile_m, _round_up(B, 128))), 128)

    # shrink until the fused-path VMEM footprint fits the per-generation budget
    while tile_m > 128:
        io_bytes = 2 * tile_m * pdims[0] * 2 + 2 * tile_m * pdims[-1] * 4
        act_bytes = 4 * tile_m * max(pdims) * 4
        if param_bytes + io_bytes + act_bytes + (4 * _MiB) <= vmem_cap:
            break
        tile_m -= 128

    # on multi-TC chips (v7x) make sure both cores get grid steps when possible
    if cores > 1:
        while tile_m > 128 and _round_up(B, tile_m) // tile_m < cores:
            tile_m = max(128, _round_up(tile_m // 2, 128))

    Bp = _round_up(B, tile_m)
    x_p = jnp.pad(x, ((0, Bp - B), (0, pdims[0] - data_dim))).astype(jnp.bfloat16)

    # ---- pick execution path --------------------------------------------------
    use_streaming = force_streaming or (param_bytes > vmem_cap // 2)

    if not use_streaming:
        out = _fused_mlp_call(x_p, w_pad, b_pad, pdims, tile_m, param_bytes, vmem_cap)
    else:
        h = x_p
        for i in range(n_linear):
            last = i == n_linear - 1
            h = _linear_relu_streamed(
                h, w_pad[i], b_pad[i],
                out_dtype=jnp.float32 if last else jnp.bfloat16,
                tile_m=tile_m, lane_pad=lane_pad, vmem_cap=vmem_cap)
        out = h

    # slice off batch + lane padding outside the kernel
    return out[:B, :latent_dim].astype(x.dtype)


# --------------------------------------------------------------------------- #
# Parameter init + references
# --------------------------------------------------------------------------- #
def init_params(key, data_dim, latent_dim, hidden_dim=512, N_layers=2):
    """Parameter init mirroring the PyTorch module.

    nn.init.kaiming_normal_(weight, nonlinearity='relu'): std = sqrt(2 / fan_in).
    Biases: PyTorch default uniform(-1/sqrt(fan_in), 1/sqrt(fan_in)).
    Weights stored transposed as (in, out) for the kernel's x @ W layout.
    """
    dims = [data_dim] + [hidden_dim] * N_layers + [latent_dim]
    weights, biases = [], []
    for i in range(len(dims) - 1):
        fan_in, fan_out = dims[i], dims[i + 1]
        key, kw, kb = jax.random.split(key, 3)
        std = (2.0 / fan_in) ** 0.5
        w = std * jax.random.normal(kw, (fan_in, fan_out), dtype=jnp.float32)
        bound = 1.0 / (fan_in ** 0.5)
        b = jax.random.uniform(kb, (1, fan_out), dtype=jnp.float32,
                               minval=-bound, maxval=bound)
        weights.append(w)
        biases.append(b)
    return weights, biases


def reference_forward(x, weights, biases, *, use_bf16=True):
    """Pure-JAX reference. use_bf16=True mimics the kernel's mixed precision."""
    n = len(weights)
    h = x.astype(jnp.bfloat16) if use_bf16 else x
    for i, (w, b) in enumerate(zip(weights, biases)):
        wc = w.astype(jnp.bfloat16) if use_bf16 else w
        acc = jnp.dot(h, wc, preferred_element_type=jnp.float32) + b
        acc = jnp.maximum(acc, 0.0)
        h = acc.astype(jnp.bfloat16) if (use_bf16 and i < n - 1) else acc
    return h.astype(jnp.float32)


if __name__ == "__main__":
    # Small, module-consistent shapes.
    batch = 16
    data_dim = 32
    hidden_dim = 64
    latent_dim = 16
    N_layers = 2   # -> 3 Linear layers total, each followed by ReLU

    key = jax.random.PRNGKey(0)
    key, kx = jax.random.split(key)
    x = jax.random.normal(kx, (batch, data_dim), dtype=jnp.float32)

    weights, biases = init_params(key, data_dim, latent_dim, hidden_dim, N_layers)

    ref_mixed = reference_forward(x, weights, biases, use_bf16=True)
    ref_f32 = reference_forward(x, weights, biases, use_bf16=False)

    # Fused (weights resident in VMEM) path.
    out = fixed_width_mlp_encoder(x, weights, biases)
    out = jax.block_until_ready(out)
    assert out.shape == (batch, latent_dim)
    assert jnp.allclose(out, ref_mixed, atol=2e-3, rtol=2e-3), \
        "fused path mismatch vs mixed-precision reference"
    assert jnp.allclose(out, ref_f32, atol=1e-1, rtol=1e-1), \
        "fused path mismatch vs f32 reference"

    # Streaming fallback path (exercised explicitly so both paths stay healthy).
    out_s = fixed_width_mlp_encoder(x, weights, biases, force_streaming=True)
    out_s = jax.block_until_ready(out_s)
    assert out_s.shape == (batch, latent_dim)
    assert jnp.allclose(out_s, ref_mixed, atol=2e-3, rtol=2e-3), \
        "streaming path mismatch vs mixed-precision reference"

    print("KERNEL_OK")
</pallas_src>

<mosaic_0001>
module attributes {stable_mosaic.version = 11 : i64} {
  func.func @kernel(%arg0: i32, %arg1: memref<128x256xbf16, #tpu.memory_space<vmem>>, %arg2: memref<256x256xbf16, #tpu.memory_space<vmem>>, %arg3: memref<1x256xf32, #tpu.memory_space<vmem>>, %arg4: memref<256x256xbf16, #tpu.memory_space<vmem>>, %arg5: memref<1x256xf32, #tpu.memory_space<vmem>>, %arg6: memref<256x256xbf16, #tpu.memory_space<vmem>>, %arg7: memref<1x256xf32, #tpu.memory_space<vmem>>, %arg8: memref<128x256xf32, #tpu.memory_space<vmem>>) attributes {dimension_semantics = [#tpu.dimension_semantics<parallel>], iteration_bounds = array<i64: 1>, scalar_prefetch = 0 : i64, scratch_operands = 0 : i64, tpu.core_type = #tpu.core_type<tc>, window_params = [{transform_indices = @transform_0, window_bounds = array<i64: 128, 256>}, {pipeline_mode = #tpu.pipeline_mode<synchronous>, transform_indices = @transform_1, window_bounds = array<i64: 256, 256>}, {pipeline_mode = #tpu.pipeline_mode<synchronous>, transform_indices = @transform_2, window_bounds = array<i64: 1, 256>}, {pipeline_mode = #tpu.pipeline_mode<synchronous>, transform_indices = @transform_3, window_bounds = array<i64: 256, 256>}, {pipeline_mode = #tpu.pipeline_mode<synchronous>, transform_indices = @transform_4, window_bounds = array<i64: 1, 256>}, {pipeline_mode = #tpu.pipeline_mode<synchronous>, transform_indices = @transform_5, window_bounds = array<i64: 256, 256>}, {pipeline_mode = #tpu.pipeline_mode<synchronous>, transform_indices = @transform_6, window_bounds = array<i64: 1, 256>}, {transform_indices = @transform_7, window_bounds = array<i64: 128, 256>}]} {
    %c0 = arith.constant 0 : index
    %c0_0 = arith.constant 0 : index
    %0 = vector.load %arg1[%c0, %c0_0] : memref<128x256xbf16, #tpu.memory_space<vmem>>, vector<128x256xbf16>
    %c0_1 = arith.constant 0 : index
    %c0_2 = arith.constant 0 : index
    %1 = vector.load %arg2[%c0_1, %c0_2] : memref<256x256xbf16, #tpu.memory_space<vmem>>, vector<256x256xbf16>
    %c0_3 = arith.constant 0 : index
    %c0_4 = arith.constant 0 : index
    %2 = vector.load %arg3[%c0_3, %c0_4] : memref<1x256xf32, #tpu.memory_space<vmem>>, vector<1x256xf32>
    %cst = arith.constant dense<0.000000e+00> : vector<128x256xf32>
    %3 = tpu.matmul %0, %1, %cst {dimension_numbers = #tpu.dot_dimension_numbers<[1], [0], [0], [1], [0, 0, 1, 1], [], []>} : vector<128x256xbf16>, vector<256x256xbf16>, vector<128x256xf32> -> vector<128x256xf32>
    %4 = vector.broadcast %2 : vector<1x256xf32> to vector<128x256xf32>
    %5 = arith.addf %3, %4 : vector<128x256xf32>
    %cst_5 = arith.constant 0.000000e+00 : f32
    %6 = vector.broadcast %cst_5 : f32 to vector<128x256xf32>
    %7 = arith.maximumf %5, %6 : vector<128x256xf32>
    %8 = arith.truncf %7 : vector<128x256xf32> to vector<128x256xbf16>
    %c0_6 = arith.constant 0 : index
    %c0_7 = arith.constant 0 : index
    %9 = vector.load %arg4[%c0_6, %c0_7] : memref<256x256xbf16, #tpu.memory_space<vmem>>, vector<256x256xbf16>
    %c0_8 = arith.constant 0 : index
    %c0_9 = arith.constant 0 : index
    %10 = vector.load %arg5[%c0_8, %c0_9] : memref<1x256xf32, #tpu.memory_space<vmem>>, vector<1x256xf32>
    %cst_10 = arith.constant dense<0.000000e+00> : vector<128x256xf32>
    %11 = tpu.matmul %8, %9, %cst_10 {dimension_numbers = #tpu.dot_dimension_numbers<[1], [0], [0], [1], [0, 0, 1, 1], [], []>} : vector<128x256xbf16>, vector<256x256xbf16>, vector<128x256xf32> -> vector<128x256xf32>
    %12 = vector.broadcast %10 : vector<1x256xf32> to vector<128x256xf32>
    %13 = arith.addf %11, %12 : vector<128x256xf32>
    %cst_11 = arith.constant 0.000000e+00 : f32
    %14 = vector.broadcast %cst_11 : f32 to vector<128x256xf32>
    %15 = arith.maximumf %13, %14 : vector<128x256xf32>
    %16 = arith.truncf %15 : vector<128x256xf32> to vector<128x256xbf16>
    %c0_12 = arith.constant 0 : index
    %c0_13 = arith.constant 0 : index
    %17 = vector.load %arg6[%c0_12, %c0_13] : memref<256x256xbf16, #tpu.memory_space<vmem>>, vector<256x256xbf16>
    %c0_14 = arith.constant 0 : index
    %c0_15 = arith.constant 0 : index
    %18 = vector.load %arg7[%c0_14, %c0_15] : memref<1x256xf32, #tpu.memory_space<vmem>>, vector<1x256xf32>
    %cst_16 = arith.constant dense<0.000000e+00> : vector<128x256xf32>
    %19 = tpu.matmul %16, %17, %cst_16 {dimension_numbers = #tpu.dot_dimension_numbers<[1], [0], [0], [1], [0, 0, 1, 1], [], []>} : vector<128x256xbf16>, vector<256x256xbf16>, vector<128x256xf32> -> vector<128x256xf32>
    %20 = vector.broadcast %18 : vector<1x256xf32> to vector<128x256xf32>
    %21 = arith.addf %19, %20 : vector<128x256xf32>
    %cst_17 = arith.constant 0.000000e+00 : f32
    %22 = vector.broadcast %cst_17 : f32 to vector<128x256xf32>
    %23 = arith.maximumf %21, %22 : vector<128x256xf32>
    %c0_18 = arith.constant 0 : index
    %c0_19 = arith.constant 0 : index
    %24 = vector.load %arg8[%c0_18, %c0_19] : memref<128x256xf32, #tpu.memory_space<vmem>>, vector<128x256xf32>
    tpu.vector_store %arg8[%c0_18, %c0_19], %23 {strides = array<i32>} : memref<128x256xf32, #tpu.memory_space<vmem>>, vector<128x256xf32>,
    return
  }
  func.func @transform_0(%arg0: i32) -> (i32, i32) {
    %c0_i32 = arith.constant 0 : i32
    %c0_i32_0 = arith.constant 0 : i32
    return %arg0, %c0_i32 : i32, i32
  }
  func.func @transform_1(%arg0: i32) -> (i32, i32) {
    %c0_i32 = arith.constant 0 : i32
    %c0_i32_0 = arith.constant 0 : i32
    %c0_i32_1 = arith.constant 0 : i32
    return %c0_i32, %c0_i32_0 : i32, i32
  }
  func.func @transform_2(%arg0: i32) -> (i32, i32) {
    %c0_i32 = arith.constant 0 : i32
    %c0_i32_0 = arith.constant 0 : i32
    %c0_i32_1 = arith.constant 0 : i32
    return %c0_i32, %c0_i32_0 : i32, i32
  }
  func.func @transform_3(%arg0: i32) -> (i32, i32) {
    %c0_i32 = arith.constant 0 : i32
    %c0_i32_0 = arith.constant 0 : i32
    %c0_i32_1 = arith.constant 0 : i32
    return %c0_i32, %c0_i32_0 : i32, i32
  }
  func.func @transform_4(%arg0: i32) -> (i32, i32) {
    %c0_i32 = arith.constant 0 : i32
    %c0_i32_0 = arith.constant 0 : i32
    %c0_i32_1 = arith.constant 0 : i32
    return %c0_i32, %c0_i32_0 : i32, i32
  }
  func.func @transform_5(%arg0: i32) -> (i32, i32) {
    %c0_i32 = arith.constant 0 : i32
    %c0_i32_0 = arith.constant 0 : i32
    %c0_i32_1 = arith.constant 0 : i32
    return %c0_i32, %c0_i32_0 : i32, i32
  }
  func.func @transform_6(%arg0: i32) -> (i32, i32) {
    %c0_i32 = arith.constant 0 : i32
    %c0_i32_0 = arith.constant 0 : i32
    %c0_i32_1 = arith.constant 0 : i32
    return %c0_i32, %c0_i32_0 : i32, i32
  }
  func.func @transform_7(%arg0: i32) -> (i32, i32) {
    %c0_i32 = arith.constant 0 : i32
    %c0_i32_0 = arith.constant 0 : i32
    return %arg0, %c0_i32 : i32, i32
  }
}

</mosaic_0001>

<bundles_post_ra>
// kernel: tpu_custom_call.1
= control target key start
LH: loop header
LB: loop body
LE: loop exit
PB: predicated region body
PF: predicated region fallthrough
CT: control target
= control target key end

     0   :  { %12 = vsyncpa [#allocation3], 0  ;;  %s2117_s0 = inlined_call_operand.hbm [shape: bf16[128,256], index: 0, kind: input, shape index: {}]   ;;  %s2118_s1 = inlined_call_operand.hbm [shape: bf16[256,256], index: 1, kind: input, shape index: {}]   ;;  %s2119_s2 = inlined_call_operand.vmem [shape: f32[1,256], index: 2, kind: input, shape index: {}]   ;;  %s2120_s3 = inlined_call_operand.hbm [shape: bf16[256,256], index: 3, kind: input, shape index: {}]   ;;  %s2121_s4 = inlined_call_operand.vmem [shape: f32[1,256], index: 4, kind: input, shape index: {}]   ;;  %s2122_s5 = inlined_call_operand.hbm [shape: bf16[256,256], index: 5, kind: input, shape index: {}]   ;;  %s2123_s6 = inlined_call_operand.vmem [shape: f32[1,256], index: 6, kind: input, shape index: {}]   ;;  %s2124_s7 = inlined_call_operand.hbm [shape: f32[128,256], index: 7, kind: output, shape index: {}]  }
   0x1   :  { %13 = vsyncpa [#allocation6], 0 }
   0x2   :  { %14 = vsyncpa [#allocation9], 0 }
   0x3   :  { %15 = vsyncpa [#allocation4], 0  ;;  %s1747_s24 = smov [#allocation5]   ;;  %s1748_s26 = smov [#allocation2]  }
   0x4   :  { %s33_s25 = sshll.u32 %s1747_s24, 4  ;;  %s21_s27 = sshll.u32 %s1748_s26, 4  ;;  %s34_s25 = int_to_ptr.vmem [resolvable:$true] %s33_s25  ;;  %s1796_s27 = int_to_ptr.vmem [resolvable:$true] %s21_s27 }
   0x5   :  { %s1629_s30 = scalar_lea.hbm %s2118_s1, 4096 }
   0x6   :  { %p1630_p0 = scmp.ne.s32.totalorder %s2118_s1, %s1629_s30  ;;  %p1633_p1 = scmp.lt.u32.totalorder %s1629_s30, %s2118_s1 }
   0x8   :  { %p1635_p2 = pnand %p1633_p1, %p1630_p0 }
   0xa   :  { %1638 = shalt.err (!%p1635_p2)
}
   0xb   :  { %s1639_s12 = scalar_lea.vmem %s34_s25, 4096  ;;  %p1644_p4 = scmp.lt.s32.totalorder %s34_s25, %s34_s25 }
   0xc   :  { %p1640_p3 = scmp.ne.s32.totalorder %s34_s25, %s1639_s12  ;;  %p1645_p5 = scmp.lt.s32.totalorder %s1639_s12, %s1639_s12 }
   0xe   :  { %p1646_p6 = por %p1645_p5, %p1644_p4 }
  0x10   :  { %p1647_p7 = pnand %p1646_p6, %p1640_p3 }
  0x12   :  { %1650 = shalt.err (!%p1647_p7)
}
  0x13   :  { %s1749_s13 = smov 128   ;;  %s1750_s14 = smov 8  }
  0x14   :  { %39 = dma.hbm_to_vmem [thread:$0]  %s2118_s1, 4096, %s34_s25, [#allocation6], %s1749_s13, %s1749_s13, %s1750_s14  }
  0x15   :  { %s1651_s19 = scalar_lea.hbm %s2117_s0, 2048 }
  0x16   :  { %p1652_p8 = scmp.ne.s32.totalorder %s2117_s0, %s1651_s19  ;;  %p1655_p9 = scmp.lt.u32.totalorder %s1651_s19, %s2117_s0 }
  0x18   :  { %p1657_p10 = pnand %p1655_p9, %p1652_p8 }
  0x1a   :  { %1660 = shalt.err (!%p1657_p10)
}
  0x1b   :  { %s1661_s24 = scalar_lea.vmem %s1796_s27, 2048  ;;  %p1666_p12 = scmp.lt.s32.totalorder %s1796_s27, %s1796_s27 }
  0x1c   :  { %p1662_p11 = scmp.ne.s32.totalorder %s1796_s27, %s1661_s24  ;;  %p1667_p13 = scmp.lt.s32.totalorder %s1661_s24, %s1661_s24 }
  0x1e   :  { %p1668_p0 = por %p1667_p13, %p1666_p12 }
  0x20   :  { %p1669_p1 = pnand %p1668_p0, %p1662_p11 }
  0x22   :  { %1672 = shalt.err (!%p1669_p1)
}
  0x23   :  { %27 = dma.hbm_to_vmem [thread:$0]  %s2117_s0, 2048, %s1796_s27, [#allocation3], %s1749_s13, %s1749_s13, %s1750_s14  }
  0x24   :  { %s1751_s26 = smov [#allocation7]   ;;  %s1752_s29 = smov [#allocation8]  }
  0x25   :  { %s47_s28 = sshll.u32 %s1751_s26, 4  ;;  %s61_s30 = sshll.u32 %s1752_s29, 4  ;;  %s48_s28 = int_to_ptr.vmem [resolvable:$true] %s47_s28  ;;  %s1833_s30 = int_to_ptr.vmem [resolvable:$true] %s61_s30 }
  0x26   :  { %s1673_s10 = scalar_lea.hbm %s2120_s3, 4096 }
  0x27   :  { %p1674_p2 = scmp.ne.s32.totalorder %s2120_s3, %s1673_s10  ;;  %p1677_p3 = scmp.lt.u32.totalorder %s1673_s10, %s2120_s3 }
  0x29   :  { %p1679_p4 = pnand %p1677_p3, %p1674_p2 }
  0x2b   :  { %1682 = shalt.err (!%p1679_p4)
}
  0x2c   :  { %s1683_s0 = scalar_lea.vmem %s48_s28, 4096  ;;  %p1688_p6 = scmp.lt.s32.totalorder %s48_s28, %s48_s28 }
  0x2d   :  { %p1684_p5 = scmp.ne.s32.totalorder %s48_s28, %s1683_s0  ;;  %p1689_p7 = scmp.lt.s32.totalorder %s1683_s0, %s1683_s0 }
  0x2f   :  { %p1690_p8 = por %p1689_p7, %p1688_p6 }
  0x31   :  { %p1691_p9 = pnand %p1690_p8, %p1684_p5 }
  0x33   :  { %1694 = shalt.err (!%p1691_p9)
}
  0x34   :  { %53 = dma.hbm_to_vmem [thread:$0]  %s2120_s3, 4096, %s48_s28, [#allocation6], %s1749_s13, %s1749_s13, %s1750_s14  }
  0x35   :  { %s1695_s20 = scalar_lea.hbm %s2122_s5, 4096 }
  0x36   :  { %p1696_p10 = scmp.ne.s32.totalorder %s2122_s5, %s1695_s20  ;;  %p1699_p11 = scmp.lt.u32.totalorder %s1695_s20, %s2122_s5 }
  0x38   :  { %p1701_p12 = pnand %p1699_p11, %p1696_p10 }
  0x3a   :  { %1704 = shalt.err (!%p1701_p12)
}
  0x3b   :  { %s1705_s1 = scalar_lea.vmem %s1833_s30, 4096  ;;  %p1710_p0 = scmp.lt.s32.totalorder %s1833_s30, %s1833_s30 }
  0x3c   :  { %p1706_p13 = scmp.ne.s32.totalorder %s1833_s30, %s1705_s1  ;;  %p1711_p1 = scmp.lt.s32.totalorder %s1705_s1, %s1705_s1 }
  0x3e   :  { %p1712_p2 = por %p1711_p1, %p1710_p0 }
  0x40   :  { %p1713_p3 = pnand %p1712_p2, %p1706_p13 }
  0x42   :  { %1716 = shalt.err (!%p1713_p3)
}
  0x43   :  { %67 = dma.hbm_to_vmem [thread:$0]  %s2122_s5, 4096, %s1833_s30, [#allocation9], %s1749_s13, %s1749_s13, %s1750_s14  }
  0x44   :  { %1739 = dma.done.wait [#allocation3], 2048  }
  0x45   :  { %1740 = vsyncadd [#allocation3], 4294965248 }
  0x46   :  { %1741 = dma.done.wait [#allocation6], 8192  }
  0x47   :  { %1742 = vsyncadd [#allocation6], 4294959104 }
  0x48   :  { %1743 = dma.done.wait [#allocation9], 4096  }
  0x49   :  { %1744 = vsyncadd [#allocation9], 4294963200  ;;  %v1461_v0 = vld [vmem:[#allocation5 + $0x4] ss:$8 sps:$4 sm:$0xff]   ;;  %v1463_v1 = vld [vmem:[#allocation5] ss:$8 sps:$4 sm:$0xff]  }
  0x4a   :  { %382 = vmatprep.subr.bf16.mxu0 %v1461_v0  ;;  %v1464_v2 = vld [vmem:[#allocation5 + $0x14] ss:$8 sps:$4 sm:$0xff]   ;;  %v1466_v3 = vld [vmem:[#allocation5 + $0x10] ss:$8 sps:$4 sm:$0xff]   ;;  %v1467_v4 = vld [vmem:[#allocation5 + $0x24] ss:$8 sps:$4 sm:$0xff]  }
  0x4b   :  { %383 = vmatpush1.bf16.msra.mxu0 %v1463_v1  ;;  %v1469_v5 = vld [vmem:[#allocation5 + $0x20] ss:$8 sps:$4 sm:$0xff]   ;;  %v1470_v6 = vld [vmem:[#allocation5 + $0x34] ss:$8 sps:$4 sm:$0xff]   ;;  %v1472_v7 = vld [vmem:[#allocation5 + $0x30] ss:$8 sps:$4 sm:$0xff]  }
  0x4c   :  { %384 = vmatprep.subr.bf16.mxu0 %v1464_v2  ;;  %v1473_v8 = vld [vmem:[#allocation5 + $0x44] ss:$8 sps:$4 sm:$0xff]   ;;  %v1475_v9 = vld [vmem:[#allocation5 + $0x40] ss:$8 sps:$4 sm:$0xff]   ;;  %v1476_v10 = vld [vmem:[#allocation5 + $0x54] ss:$8 sps:$4 sm:$0xff]  }
  0x4d   :  { %v1478_v11 = vld [vmem:[#allocation5 + $0x50] ss:$8 sps:$4 sm:$0xff]   ;;  %v1479_v12 = vld [vmem:[#allocation5 + $0x64] ss:$8 sps:$4 sm:$0xff]   ;;  %v1481_v14 = vld [vmem:[#allocation5 + $0x60] ss:$8 sps:$4 sm:$0xff]  }
  0x4e   :  { %v1511_v13 = vld [vmem:[#allocation2 + $0x4] ss:$8 sps:$4 sm:$0xff]   ;;  %v1482_v15 = vld [vmem:[#allocation5 + $0x74] ss:$8 sps:$4 sm:$0xff]   ;;  %v1484_v16 = vld [vmem:[#allocation5 + $0x70] ss:$8 sps:$4 sm:$0xff]  }
  0x4f   :  { %385 = vmatpush1.bf16.msra.mxu0 %v1466_v3  ;;  %414 = vmatprep.mubr.bf16.mxu0 %v1511_v13  ;;  %v1485_v17 = vld [vmem:[#allocation5 + $0x84] ss:$8 sps:$4 sm:$0xff]   ;;  %v1487_v18 = vld [vmem:[#allocation5 + $0x80] ss:$8 sps:$4 sm:$0xff]   ;;  %v1488_v19 = vld [vmem:[#allocation5 + $0x94] ss:$8 sps:$4 sm:$0xff]  }
  0x50   :  { %386 = vmatprep.subr.bf16.mxu0 %v1467_v4  ;;  %v1533_v20 = vld [vmem:[#allocation7 + $0x4] ss:$8 sps:$4 sm:$0xff]   ;;  %v1535_v21 = vld [vmem:[#allocation7] ss:$8 sps:$4 sm:$0xff]   ;;  %v1490_v22 = vld [vmem:[#allocation5 + $0x90] ss:$8 sps:$4 sm:$0xff]  }
  0x51   :  { %747 = vmatprep.subr.bf16.mxu1 %v1533_v20  ;;  %v1536_v23 = vld [vmem:[#allocation7 + $0x14] ss:$8 sps:$4 sm:$0xff]   ;;  %v1491_v24 = vld [vmem:[#allocation5 + $0xa4] ss:$8 sps:$4 sm:$0xff]   ;;  %v1538_v25 = vld [vmem:[#allocation7 + $0x10] ss:$8 sps:$4 sm:$0xff]  }
  0x52   :  { %748 = vmatpush1.bf16.msra.mxu1 %v1535_v21  ;;  %v1539_v26 = vld [vmem:[#allocation7 + $0x24] ss:$8 sps:$4 sm:$0xff]   ;;  %v1493_v27 = vld [vmem:[#allocation5 + $0xa0] ss:$8 sps:$4 sm:$0xff]   ;;  %v1494_v28 = vld [vmem:[#allocation5 + $0xb4] ss:$8 sps:$4 sm:$0xff]  }
  0x53   :  { %387 = vmatpush1.bf16.msra.mxu0 %v1469_v5  ;;  %749 = vmatprep.subr.bf16.mxu1 %v1536_v23  ;;  %v1541_v29 = vld [vmem:[#allocation7 + $0x20] ss:$8 sps:$4 sm:$0xff]   ;;  %v1542_v30 = vld [vmem:[#allocation7 + $0x34] ss:$8 sps:$4 sm:$0xff]   ;;  %v1496_v31 = vld [vmem:[#allocation5 + $0xb0] ss:$8 sps:$4 sm:$0xff]  }
  0x54   :  { %388 = vmatprep.subr.bf16.mxu0 %v1470_v6  ;;  %v1497_v32 = vld [vmem:[#allocation5 + $0xc4] ss:$8 sps:$4 sm:$0xff]   ;;  %v1544_v33 = vld [vmem:[#allocation7 + $0x30] ss:$8 sps:$4 sm:$0xff]   ;;  %v1499_v35 = vld [vmem:[#allocation5 + $0xc0] ss:$8 sps:$4 sm:$0xff]  }
  0x55   :  { %v1545_v34 = vld [vmem:[#allocation7 + $0x44] ss:$8 sps:$4 sm:$0xff]   ;;  %v1500_v36 = vld [vmem:[#allocation5 + $0xd4] ss:$8 sps:$4 sm:$0xff]   ;;  %v1547_v37 = vld [vmem:[#allocation7 + $0x40] ss:$8 sps:$4 sm:$0xff]  }
  0x56   :  { %750 = vmatpush1.bf16.msra.mxu1 %v1538_v25  ;;  %v1548_v38 = vld [vmem:[#allocation7 + $0x54] ss:$8 sps:$4 sm:$0xff]   ;;  %v1502_v39 = vld [vmem:[#allocation5 + $0xd0] ss:$8 sps:$4 sm:$0xff]   ;;  %v1503_v40 = vld [vmem:[#allocation5 + $0xe4] ss:$8 sps:$4 sm:$0xff]  }
  0x57   :  { %389 = vmatpush1.bf16.msra.mxu0 %v1472_v7  ;;  %751 = vmatprep.subr.bf16.mxu1 %v1539_v26  ;;  %v1550_v41 = vld [vmem:[#allocation7 + $0x50] ss:$8 sps:$4 sm:$0xff]   ;;  %v1551_v42 = vld [vmem:[#allocation7 + $0x64] ss:$8 sps:$4 sm:$0xff]   ;;  %v1505_v43 = vld [vmem:[#allocation5 + $0xe0] ss:$8 sps:$4 sm:$0xff]  }
  0x58   :  { %390 = vmatprep.subr.bf16.mxu0 %v1473_v8  ;;  %v1553_v44 = vld [vmem:[#allocation7 + $0x60] ss:$8 sps:$4 sm:$0xff]   ;;  %v1506_v45 = vld [vmem:[#allocation5 + $0xf4] ss:$8 sps:$4 sm:$0xff]   ;;  %v1508_v47 = vld [vmem:[#allocation5 + $0xf0] ss:$8 sps:$4 sm:$0xff]  }
  0x59   :  { %v1554_v46 = vld [vmem:[#allocation7 + $0x74] ss:$8 sps:$4 sm:$0xff]   ;;  %v1556_v48 = vld [vmem:[#allocation7 + $0x70] ss:$8 sps:$4 sm:$0xff]   ;;  %v1557_v49 = vld [vmem:[#allocation7 + $0x84] ss:$8 sps:$4 sm:$0xff]  }
  0x5a   :  { %752 = vmatpush1.bf16.msra.mxu1 %v1541_v29  ;;  %v1509_v50 = vld [vmem:[#allocation2] ss:$8 sps:$4 sm:$0xff]   ;;  %v1512_v51 = vld [vmem:[#allocation2 + $0x14] ss:$8 sps:$4 sm:$0xff]   ;;  %v1562_v54 = vld [vmem:[#allocation7 + $0x90] ss:$8 sps:$4 sm:$0xff]  }
  0x5b   :  { %391 = vmatpush1.bf16.msra.mxu0 %v1475_v9  ;;  %753 = vmatprep.subr.bf16.mxu1 %v1542_v30  ;;  %v1559_v52 = vld [vmem:[#allocation7 + $0x80] ss:$8 sps:$4 sm:$0xff]   ;;  %v1560_v53 = vld [vmem:[#allocation7 + $0x94] ss:$8 sps:$4 sm:$0xff]   ;;  %v1563_v55 = vld [vmem:[#allocation7 + $0xa4] ss:$8 sps:$4 sm:$0xff]  }
  0x5c   :  { %392 = vmatprep.subr.bf16.mxu0 %v1476_v10  ;;  %v1514_v56 = vld [vmem:[#allocation2 + $0x10] ss:$8 sps:$4 sm:$0xff]   ;;  %v1515_v57 = vld [vmem:[#allocation2 + $0x24] ss:$8 sps:$4 sm:$0xff]   ;;  %v1565_v58 = vld [vmem:[#allocation7 + $0xa0] ss:$8 sps:$4 sm:$0xff]  }
  0x5d   :  { %v1566_v59 = vld [vmem:[#allocation7 + $0xb4] ss:$8 sps:$4 sm:$0xff]   ;;  %v1568_v60 = vld [vmem:[#allocation7 + $0xb0] ss:$8 sps:$4 sm:$0xff]   ;;  %v1569_v61 = vld [vmem:[#allocation7 + $0xc4] ss:$8 sps:$4 sm:$0xff]  }
  0x5e   :  { %754 = vmatpush1.bf16.msra.mxu1 %v1544_v33  ;;  %v1517_v62 = vld [vmem:[#allocation2 + $0x20] ss:$8 sps:$4 sm:$0xff]   ;;  %v1518_v63 = vld [vmem:[#allocation2 + $0x34] ss:$8 sps:$4 sm:$0xff]   ;;  %v1520_v2 = vld [vmem:[#allocation2 + $0x30] ss:$8 sps:$4 sm:$0xff]  }
  0x5f   :  { %393 = vmatpush1.bf16.msra.mxu0 %v1478_v11  ;;  %755 = vmatprep.subr.bf16.mxu1 %v1545_v34  ;;  %v1571_v0 = vld [vmem:[#allocation7 + $0xc0] ss:$8 sps:$4 sm:$0xff]   ;;  %v1572_v1 = vld [vmem:[#allocation7 + $0xd4] ss:$8 sps:$4 sm:$0xff]   ;;  %v1521_v3 = vld [vmem:[#allocation2 + $0x44] ss:$8 sps:$4 sm:$0xff]  }
  0x60   :  { %394 = vmatprep.subr.bf16.mxu0 %v1479_v12  ;;  %v1523_v4 = vld [vmem:[#allocation2 + $0x40] ss:$8 sps:$4 sm:$0xff]   ;;  %v1524_v5 = vld [vmem:[#allocation2 + $0x54] ss:$8 sps:$4 sm:$0xff]   ;;  %v1526_v6 = vld [vmem:[#allocation2 + $0x50] ss:$8 sps:$4 sm:$0xff]  }
  0x61   :  { %v1527_v7 = vld [vmem:[#allocation2 + $0x64] ss:$8 sps:$4 sm:$0xff]   ;;  %v1529_v8 = vld [vmem:[#allocation2 + $0x60] ss:$8 sps:$4 sm:$0xff]   ;;  %v1530_v9 = vld [vmem:[#allocation2 + $0x74] ss:$8 sps:$4 sm:$0xff]  }
  0x62   :  { %756 = vmatpush1.bf16.msra.mxu1 %v1547_v37  ;;  %v1532_v10 = vld [vmem:[#allocation2 + $0x70] ss:$8 sps:$4 sm:$0xff]   ;;  %v1575_v12 = vld [vmem:[#allocation7 + $0xe4] ss:$8 sps:$4 sm:$0xff]   ;;  %v1577_v13 = vld [vmem:[#allocation7 + $0xe0] ss:$8 sps:$4 sm:$0xff]  }
  0x63   :  { %395 = vmatpush1.bf16.msra.mxu0 %v1481_v14  ;;  %757 = vmatprep.subr.bf16.mxu1 %v1548_v38  ;;  %v1574_v11 = vld [vmem:[#allocation7 + $0xd0] ss:$8 sps:$4 sm:$0xff]   ;;  %v1578_v14 = vld [vmem:[#allocation7 + $0xf4] ss:$8 sps:$4 sm:$0xff]   ;;  %v1878_v20 = vld [vmem:[#allocation8 + $0x24] ss:$8 sps:$4 sm:$0xff]  }
  0x64   :  { %396 = vmatprep.subr.bf16.mxu0 %v1482_v15  ;;  %v1580_v15 = vld [vmem:[#allocation7 + $0xf0] ss:$8 sps:$4 sm:$0xff]   ;;  %v1881_v21 = vld [vmem:[#allocation8 + $0x20] ss:$8 sps:$4 sm:$0xff]   ;;  %v1896_v26 = vld [vmem:[#allocation8 + $0x54] ss:$8 sps:$4 sm:$0xff]  }
  0x65   :  { %v1887_v23 = vld [vmem:[#allocation8 + $0x30] ss:$8 sps:$4 sm:$0xff]   ;;  %v1893_v25 = vld [vmem:[#allocation8 + $0x40] ss:$8 sps:$4 sm:$0xff]   ;;  %v1908_v30 = vld [vmem:[#allocation8 + $0x74] ss:$8 sps:$4 sm:$0xff]  }
  0x66   :  { %758 = vmatpush1.bf16.msra.mxu1 %v1550_v41  ;;  %v1905_v29 = vld [vmem:[#allocation8 + $0x60] ss:$8 sps:$4 sm:$0xff]   ;;  %v1920_v34 = vld [vmem:[#allocation8 + $0x94] ss:$8 sps:$4 sm:$0xff]   ;;  %v132_v41 = vlaneseq }
  0x67   :  { %397 = vmatpush1.bf16.msra.mxu0 %v1484_v16  ;;  %759 = vmatprep.subr.bf16.mxu1 %v1551_v42  ;;  %v1870_v16 = vld [vmem:[#allocation8] ss:$8 sps:$4 sm:$0xff]   ;;  %v1932_v38 = vld [vmem:[#allocation8 + $0xb4] ss:$8 sps:$4 sm:$0xff]  }
  0x68   :  { %398 = vmatprep.subr.bf16.mxu0 %v1485_v17  ;;  %v1583_v17 = vld [vmem:[#allocation8 + $0x4] ss:$8 sps:$4 sm:$0xff]   ;;  %v1917_v33 = vld [vmem:[#allocation8 + $0x80] ss:$8 sps:$4 sm:$0xff]  }
  0x69   :  { %v1929_v37 = vld [vmem:[#allocation8 + $0xa0] ss:$8 sps:$4 sm:$0xff]  }
  0x6a   :  { %760 = vmatpush1.bf16.msra.mxu1 %v1553_v44  ;;  %v1941_v42 = vld [vmem:[#allocation8 + $0xc0] ss:$8 sps:$4 sm:$0xff]   ;;  %v133_v44 = vshrl.u32 %v132_v41, 7 }
  0x6b   :  { %399 = vmatpush1.bf16.msra.mxu0 %v1487_v18  ;;  %761 = vmatprep.subr.bf16.mxu1 %v1554_v46  ;;  %v1872_v18 = vld [vmem:[#allocation8 + $0x14] ss:$8 sps:$4 sm:$0xff]  }
  0x6c   :  { %400 = vmatprep.subr.bf16.mxu0 %v1488_v19  ;;  %v1875_v19 = vld [vmem:[#allocation8 + $0x10] ss:$8 sps:$4 sm:$0xff]   ;;  %v1950_v46 = vsub.s32 0, %v133_v44 }
  0x6e   :  { %762 = vmatpush1.bf16.msra.mxu1 %v1556_v48  ;;  %v1955_v48 = vsub.s32 1, %v133_v44 }
  0x6f   :  { %401 = vmatpush1.bf16.msra.mxu0 %v1490_v22  ;;  %763 = vmatprep.subr.bf16.mxu1 %v1557_v49  ;;  %v1884_v22 = vld [vmem:[#allocation8 + $0x34] ss:$8 sps:$4 sm:$0xff]  }
  0x70   :  { %402 = vmatprep.subr.bf16.mxu0 %v1491_v24  ;;  %v1890_v24 = vld [vmem:[#allocation8 + $0x44] ss:$8 sps:$4 sm:$0xff]  }
  0x72   :  { %764 = vmatpush1.bf16.msra.mxu1 %v1559_v52 }
  0x73   :  { %403 = vmatpush1.bf16.msra.mxu0 %v1493_v27  ;;  %765 = vmatprep.subr.bf16.mxu1 %v1560_v53  ;;  %v1899_v27 = vld [vmem:[#allocation8 + $0x50] ss:$8 sps:$4 sm:$0xff]  }
  0x74   :  { %404 = vmatprep.subr.bf16.mxu0 %v1494_v28  ;;  %v1902_v28 = vld [vmem:[#allocation8 + $0x64] ss:$8 sps:$4 sm:$0xff]  }
  0x76   :  { %766 = vmatpush1.bf16.msra.mxu1 %v1562_v54 }
  0x77   :  { %405 = vmatpush1.bf16.msra.mxu0 %v1496_v31  ;;  %767 = vmatprep.subr.bf16.mxu1 %v1563_v55  ;;  %v1911_v31 = vld [vmem:[#allocation8 + $0x70] ss:$8 sps:$4 sm:$0xff]  }
  0x78   :  { %406 = vmatprep.subr.bf16.mxu0 %v1497_v32  ;;  %v1914_v32 = vld [vmem:[#allocation8 + $0x84] ss:$8 sps:$4 sm:$0xff]  }
  0x7a   :  { %768 = vmatpush1.bf16.msra.mxu1 %v1565_v58 }
  0x7b   :  { %407 = vmatpush1.bf16.msra.mxu0 %v1499_v35  ;;  %769 = vmatprep.subr.bf16.mxu1 %v1566_v59  ;;  %v1923_v35 = vld [vmem:[#allocation8 + $0x90] ss:$8 sps:$4 sm:$0xff]  }
  0x7c   :  { %408 = vmatprep.subr.bf16.mxu0 %v1500_v36  ;;  %v1926_v36 = vld [vmem:[#allocation8 + $0xa4] ss:$8 sps:$4 sm:$0xff]  }
  0x7e   :  { %770 = vmatpush1.bf16.msra.mxu1 %v1568_v60 }
  0x7f   :  { %409 = vmatpush1.bf16.msra.mxu0 %v1502_v39  ;;  %771 = vmatprep.subr.bf16.mxu1 %v1569_v61  ;;  %v1935_v39 = vld [vmem:[#allocation8 + $0xb0] ss:$8 sps:$4 sm:$0xff]  }
  0x80   :  { %410 = vmatprep.subr.bf16.mxu0 %v1503_v40  ;;  %v1938_v40 = vld [vmem:[#allocation8 + $0xc4] ss:$8 sps:$4 sm:$0xff]  }
  0x82   :  { %772 = vmatpush1.bf16.msra.mxu1 %v1571_v0 }
  0x83   :  { %411 = vmatpush1.bf16.msra.mxu0 %v1505_v43  ;;  %773 = vmatprep.subr.bf16.mxu1 %v1572_v1  ;;  %v1944_v43 = vld [vmem:[#allocation8 + $0xd4] ss:$8 sps:$4 sm:$0xff]  }
  0x84   :  { %412 = vmatprep.subr.bf16.mxu0 %v1506_v45  ;;  %v1947_v45 = vld [vmem:[#allocation8 + $0xd0] ss:$8 sps:$4 sm:$0xff]  }
  0x86   :  { %774 = vmatpush1.bf16.msra.mxu1 %v1574_v11 }
  0x87   :  { %413 = vmatpush1.bf16.msra.mxu0 %v1508_v47  ;;  %775 = vmatprep.subr.bf16.mxu1 %v1575_v12  ;;  %v130_v47 = vld [vmem:[%s2119_s2] sm:$0x3] }
  0x88   :  { %1112 = vmatprep.subr.bf16.mxu0 %v1583_v17  ;;  %v1959_v49 = vrot.slane %v130_v47, %v1950_v46 }
  0x8a   :  { %415 = vmatmul.mubr.bf16.vlgmr.msra.gmra.mrb[0].mxu0 %v1509_v50  ;;  %776 = vmatpush1.bf16.msra.mxu1 %v1577_v13  ;;  %v1962_v50 = vrot.slane %v130_v47, %v1955_v48 }
  0x8b   :  { %424 = vmatprep.mubr.bf16.mxu0 %v1512_v51  ;;  %777 = vmatprep.subr.bf16.mxu1 %v1578_v14 }
  0x8c   :  { %1113 = vmatpush1.bf16.msra.mxu0 %v1870_v16 }
  0x8d   :  { %1114 = vmatprep.subr.bf16.mxu0 %v1872_v18 }
  0x8e   :  { %778 = vmatpush1.bf16.msra.mxu1 %v1580_v15 }
  0x8f   :  { %1420 = vmatprep.subr.bf16.mxu1 %v1583_v17 }
  0x90   :  { %1115 = vmatpush1.bf16.msra.mxu0 %v1875_v19 }
  0x91   :  { %1116 = vmatprep.subr.bf16.mxu0 %v1878_v20 }
  0x92   :  { %425 = vmatmul.mubr.bf16.gmra.mrb[4].mxu0 %v1514_v56 }
  0x93   :  { %434 = vmatprep.mubr.bf16.mxu0 %v1515_v57 }
  0x94   :  { %1117 = vmatpush1.bf16.msra.mxu0 %v1881_v21 }
  0x95   :  { %1118 = vmatprep.subr.bf16.mxu0 %v1884_v22 }
  0x98   :  { %1119 = vmatpush1.bf16.msra.mxu0 %v1887_v23 }
  0x99   :  { %1120 = vmatprep.subr.bf16.mxu0 %v1890_v24 }
  0x9a   :  { %435 = vmatmul.mubr.bf16.gmra.mrb[8].mxu0 %v1517_v62 }
  0x9b   :  { %444 = vmatprep.mubr.bf16.mxu0 %v1518_v63 }
  0x9c   :  { %1121 = vmatpush1.bf16.msra.mxu0 %v1893_v25 }
  0x9d   :  { %1122 = vmatprep.subr.bf16.mxu0 %v1896_v26 }
  0xa0   :  { %1123 = vmatpush1.bf16.msra.mxu0 %v1899_v27 }
  0xa1   :  { %1124 = vmatprep.subr.bf16.mxu0 %v1902_v28 }
  0xa2   :  { %445 = vmatmul.mubr.bf16.gmra.mrb[12].mxu0 %v1520_v2 }
  0xa3   :  { %454 = vmatprep.mubr.bf16.mxu0 %v1521_v3 }
  0xa4   :  { %1125 = vmatpush1.bf16.msra.mxu0 %v1905_v29 }
  0xa5   :  { %1126 = vmatprep.subr.bf16.mxu0 %v1908_v30 }
  0xa8   :  { %1127 = vmatpush1.bf16.msra.mxu0 %v1911_v31 }
  0xa9   :  { %1128 = vmatprep.subr.bf16.mxu0 %v1914_v32 }
  0xaa   :  { %455 = vmatmul.mubr.bf16.gmra.mrb[16].mxu0 %v1523_v4 }
  0xab   :  { %464 = vmatprep.mubr.bf16.mxu0 %v1524_v5 }
  0xac   :  { %1129 = vmatpush1.bf16.msra.mxu0 %v1917_v33 }
  0xad   :  { %1130 = vmatprep.subr.bf16.mxu0 %v1920_v34 }
  0xb0   :  { %1131 = vmatpush1.bf16.msra.mxu0 %v1923_v35 }
  0xb1   :  { %1132 = vmatprep.subr.bf16.mxu0 %v1926_v36 }
  0xb2   :  { %465 = vmatmul.mubr.bf16.gmra.mrb[20].mxu0 %v1526_v6 }
  0xb3   :  { %474 = vmatprep.mubr.bf16.mxu0 %v1527_v7 }
  0xb4   :  { %1133 = vmatpush1.bf16.msra.mxu0 %v1929_v37 }
  0xb5   :  { %1134 = vmatprep.subr.bf16.mxu0 %v1932_v38 }
  0xb8   :  { %1135 = vmatpush1.bf16.msra.mxu0 %v1935_v39 }
  0xb9   :  { %1136 = vmatprep.subr.bf16.mxu0 %v1938_v40 }
  0xba   :  { %475 = vmatmul.mubr.bf16.gmra.mrb[24].mxu0 %v1529_v8 }
  0xbb   :  { %484 = vmatprep.mubr.bf16.mxu0 %v1530_v9 }
  0xbc   :  { %1137 = vmatpush1.bf16.msra.mxu0 %v1941_v42 }
  0xbd   :  { %1138 = vmatprep.subr.bf16.mxu0 %v1944_v43 }
  0xc0   :  { %1139 = vmatpush1.bf16.msra.mxu0 %v1947_v45 }
  0xc2   :  { %485 = vmatmul.mubr.bf16.gmra.mrb[28].mxu0 %v1532_v10 }
 0x15d   :  { %v416_v51 = vpop.f32.mrb[0].mxu0 }
 0x15e   :  { %v417_v52 = vadd.f32 %v416_v51, %v1959_v49  ;;  %v418_v53 = vpop.f32.mrb[1].mxu0 }
 0x15f   :  { %v419_v54 = vadd.f32 %v418_v53, %v1962_v50  ;;  %v420_v55 = vpop.f32.mrb[2].mxu0 }
 0x160   :  { %v421_v56 = vadd.f32 %v420_v55, %v1959_v49  ;;  %v422_v57 = vpop.f32.mrb[3].mxu0  ;;  %v495_v59 = vmax.f32 %v417_v52, 0.0 }
 0x161   :  { %v423_v58 = vadd.f32 %v422_v57, %v1962_v50  ;;  %v496_v61 = vmax.f32 %v419_v54, 0.0 }
 0x162   :  { %v497_v60 = vmax.f32 %v421_v56, 0.0 }
 0x163   :  { %v498_v62 = vmax.f32 %v423_v58, 0.0 }
 0x164   :  { %v527_v63 = vpack.c.bf16 %v497_v60, %v495_v59 }
 0x165   :  { %v426_v0 = vpop.f32.mrb[4].mxu0  ;;  %v528_v1 = vpack.c.bf16 %v498_v62, %v496_v61 }
 0x166   :  { %v427_v2 = vadd.f32 %v426_v0, %v1959_v49  ;;  %v428_v3 = vpop.f32.mrb[5].mxu0 }
 0x167   :  { %v429_v4 = vadd.f32 %v428_v3, %v1962_v50  ;;  %v430_v5 = vpop.f32.mrb[6].mxu0  ;;  %779 = vmatprep.mubr.bf16.mxu1 %v528_v1 }
 0x168   :  { %v431_v6 = vadd.f32 %v430_v5, %v1959_v49  ;;  %v432_v7 = vpop.f32.mrb[7].mxu0  ;;  %780 = vmatmul.mubr.bf16.vlgmr.msra.gmra.mrb[0].mxu1 %v527_v63  ;;  %v499_v9 = vmax.f32 %v427_v2, 0.0 }
 0x169   :  { %v433_v8 = vadd.f32 %v432_v7, %v1962_v50  ;;  %1436 = vmatpush1.bf16.msra.mxu1 %v1870_v16  ;;  %v500_v11 = vmax.f32 %v429_v4, 0.0 }
 0x16a   :  { %v501_v10 = vmax.f32 %v431_v6, 0.0  ;;  %1421 = vmatprep.subr.bf16.mxu1 %v1872_v18 }
 0x16b   :  { %v502_v12 = vmax.f32 %v433_v8, 0.0 }
 0x16c   :  { %v529_v13 = vpack.c.bf16 %v501_v10, %v499_v9 }
 0x16d   :  { %v530_v14 = vpack.c.bf16 %v502_v12, %v500_v11  ;;  %v436_v15 = vpop.f32.mrb[8].mxu0  ;;  %1437 = vmatpush1.bf16.msra.mxu1 %v1875_v19 }
 0x16e   :  { %v437_v17 = vadd.f32 %v436_v15, %v1959_v49  ;;  %v438_v41 = vpop.f32.mrb[9].mxu0  ;;  %1422 = vmatprep.subr.bf16.mxu1 %v1878_v20 }
 0x16f   :  { %v439_v44 = vadd.f32 %v438_v41, %v1962_v50  ;;  %v440_v47 = vpop.f32.mrb[10].mxu0  ;;  %789 = vmatprep.mubr.bf16.mxu1 %v530_v14 }
 0x170   :  { %v441_v16 = vadd.f32 %v440_v47, %v1959_v49  ;;  %v442_v51 = vpop.f32.mrb[11].mxu0  ;;  %790 = vmatmul.mubr.bf16.gmra.mrb[4].mxu1 %v529_v13  ;;  %v503_v52 = vmax.f32 %v437_v17, 0.0 }
 0x171   :  { %v443_v18 = vadd.f32 %v442_v51, %v1962_v50  ;;  %1438 = vmatpush1.bf16.msra.mxu1 %v1881_v21  ;;  %v504_v19 = vmax.f32 %v439_v44, 0.0 }
 0x172   :  { %v505_v53 = vmax.f32 %v441_v16, 0.0  ;;  %1423 = vmatprep.subr.bf16.mxu1 %v1884_v22 }
 0x173   :  { %v506_v54 = vmax.f32 %v443_v18, 0.0 }
 0x174   :  { %v531_v55 = vpack.c.bf16 %v505_v53, %v503_v52 }
 0x175   :  { %v532_v20 = vpack.c.bf16 %v506_v54, %v504_v19  ;;  %v446_v56 = vpop.f32.mrb[12].mxu0  ;;  %1439 = vmatpush1.bf16.msra.mxu1 %v1887_v23 }
 0x176   :  { %v447_v57 = vadd.f32 %v446_v56, %v1959_v49  ;;  %v448_v58 = vpop.f32.mrb[13].mxu0  ;;  %1424 = vmatprep.subr.bf16.mxu1 %v1890_v24 }
 0x177   :  { %v449_v59 = vadd.f32 %v448_v58, %v1962_v50  ;;  %v450_v60 = vpop.f32.mrb[14].mxu0  ;;  %799 = vmatprep.mubr.bf16.mxu1 %v532_v20 }
 0x178   :  { %v451_v21 = vadd.f32 %v450_v60, %v1959_v49  ;;  %v452_v61 = vpop.f32.mrb[15].mxu0  ;;  %800 = vmatmul.mubr.bf16.gmra.mrb[8].mxu1 %v531_v55  ;;  %v507_v62 = vmax.f32 %v447_v57, 0.0 }
 0x179   :  { %v453_v22 = vadd.f32 %v452_v61, %v1962_v50  ;;  %1440 = vmatpush1.bf16.msra.mxu1 %v1893_v25  ;;  %v508_v23 = vmax.f32 %v449_v59, 0.0 }
 0x17a   :  { %v509_v63 = vmax.f32 %v451_v21, 0.0  ;;  %1425 = vmatprep.subr.bf16.mxu1 %v1896_v26 }
 0x17b   :  { %v510_v0 = vmax.f32 %v453_v22, 0.0 }
 0x17c   :  { %v533_v1 = vpack.c.bf16 %v509_v63, %v507_v62 }
 0x17d   :  { %v534_v24 = vpack.c.bf16 %v510_v0, %v508_v23  ;;  %v456_v2 = vpop.f32.mrb[16].mxu0  ;;  %1441 = vmatpush1.bf16.msra.mxu1 %v1899_v27 }
 0x17e   :  { %v457_v3 = vadd.f32 %v456_v2, %v1959_v49  ;;  %v458_v4 = vpop.f32.mrb[17].mxu0  ;;  %1426 = vmatprep.subr.bf16.mxu1 %v1902_v28 }
 0x17f   :  { %v459_v5 = vadd.f32 %v458_v4, %v1962_v50  ;;  %v460_v6 = vpop.f32.mrb[18].mxu0  ;;  %809 = vmatprep.mubr.bf16.mxu1 %v534_v24  ;;  %v1625_v24 = vld [vmem:[#allocation8 + $0xe4] ss:$8 sps:$4 sm:$0xff]  }
 0x180   :  { %v461_v25 = vadd.f32 %v460_v6, %v1959_v49  ;;  %v462_v7 = vpop.f32.mrb[19].mxu0  ;;  %810 = vmatmul.mubr.bf16.gmra.mrb[12].mxu1 %v533_v1  ;;  %v511_v8 = vmax.f32 %v457_v3, 0.0  ;;  %1140 = vmatprep.subr.bf16.mxu0 %v1625_v24 }
 0x181   :  { %v463_v26 = vadd.f32 %v462_v7, %v1962_v50  ;;  %1442 = vmatpush1.bf16.msra.mxu1 %v1905_v29  ;;  %v512_v27 = vmax.f32 %v459_v5, 0.0 }
 0x182   :  { %v513_v9 = vmax.f32 %v461_v25, 0.0  ;;  %1427 = vmatprep.subr.bf16.mxu1 %v1908_v30 }
 0x183   :  { %v514_v10 = vmax.f32 %v463_v26, 0.0 }
 0x184   :  { %v535_v11 = vpack.c.bf16 %v513_v9, %v511_v8 }
 0x185   :  { %v536_v28 = vpack.c.bf16 %v514_v10, %v512_v27  ;;  %v466_v12 = vpop.f32.mrb[20].mxu0  ;;  %1443 = vmatpush1.bf16.msra.mxu1 %v1911_v31 }
 0x186   :  { %v467_v13 = vadd.f32 %v466_v12, %v1959_v49  ;;  %v468_v14 = vpop.f32.mrb[21].mxu0  ;;  %1428 = vmatprep.subr.bf16.mxu1 %v1914_v32 }
 0x187   :  { %v469_v15 = vadd.f32 %v468_v14, %v1962_v50  ;;  %v470_v17 = vpop.f32.mrb[22].mxu0  ;;  %819 = vmatprep.mubr.bf16.mxu1 %v536_v28 }
 0x188   :  { %v471_v29 = vadd.f32 %v470_v17, %v1959_v49  ;;  %v472_v41 = vpop.f32.mrb[23].mxu0  ;;  %820 = vmatmul.mubr.bf16.gmra.mrb[16].mxu1 %v535_v11  ;;  %v515_v44 = vmax.f32 %v467_v13, 0.0 }
 0x189   :  { %v473_v30 = vadd.f32 %v472_v41, %v1962_v50  ;;  %1444 = vmatpush1.bf16.msra.mxu1 %v1917_v33  ;;  %v516_v31 = vmax.f32 %v469_v15, 0.0 }
 0x18a   :  { %v517_v47 = vmax.f32 %v471_v29, 0.0  ;;  %1429 = vmatprep.subr.bf16.mxu1 %v1920_v34 }
 0x18b   :  { %v518_v16 = vmax.f32 %v473_v30, 0.0 }
 0x18c   :  { %v537_v51 = vpack.c.bf16 %v517_v47, %v515_v44 }
 0x18d   :  { %v538_v32 = vpack.c.bf16 %v518_v16, %v516_v31  ;;  %v476_v18 = vpop.f32.mrb[24].mxu0  ;;  %1445 = vmatpush1.bf16.msra.mxu1 %v1923_v35 }
 0x18e   :  { %v477_v52 = vadd.f32 %v476_v18, %v1959_v49  ;;  %v478_v53 = vpop.f32.mrb[25].mxu0  ;;  %1430 = vmatprep.subr.bf16.mxu1 %v1926_v36 }
 0x18f   :  { %v479_v19 = vadd.f32 %v478_v53, %v1962_v50  ;;  %v480_v54 = vpop.f32.mrb[26].mxu0  ;;  %829 = vmatprep.mubr.bf16.mxu1 %v538_v32 }
 0x190   :  { %v481_v33 = vadd.f32 %v480_v54, %v1959_v49  ;;  %v482_v55 = vpop.f32.mrb[27].mxu0  ;;  %830 = vmatmul.mubr.bf16.gmra.mrb[20].mxu1 %v537_v51  ;;  %v519_v20 = vmax.f32 %v477_v52, 0.0 }
 0x191   :  { %v483_v34 = vadd.f32 %v482_v55, %v1962_v50  ;;  %1446 = vmatpush1.bf16.msra.mxu1 %v1929_v37  ;;  %v520_v35 = vmax.f32 %v479_v19, 0.0 }
 0x192   :  { %v521_v56 = vmax.f32 %v481_v33, 0.0  ;;  %1431 = vmatprep.subr.bf16.mxu1 %v1932_v38 }
 0x193   :  { %v522_v57 = vmax.f32 %v483_v34, 0.0 }
 0x194   :  { %v539_v58 = vpack.c.bf16 %v521_v56, %v519_v20 }
 0x195   :  { %v540_v36 = vpack.c.bf16 %v522_v57, %v520_v35  ;;  %v486_v59 = vpop.f32.mrb[28].mxu0  ;;  %1447 = vmatpush1.bf16.msra.mxu1 %v1935_v39 }
 0x196   :  { %v487_v60 = vadd.f32 %v486_v59, %v1959_v49  ;;  %v488_v21 = vpop.f32.mrb[29].mxu0  ;;  %1432 = vmatprep.subr.bf16.mxu1 %v1938_v40 }
 0x197   :  { %v489_v61 = vadd.f32 %v488_v21, %v1962_v50  ;;  %v490_v22 = vpop.f32.mrb[30].mxu0  ;;  %839 = vmatprep.mubr.bf16.mxu1 %v540_v36 }
 0x198   :  { %v491_v37 = vadd.f32 %v490_v22, %v1959_v49  ;;  %v492_v62 = vpop.f32.mrb[31].mxu0  ;;  %840 = vmatmul.mubr.bf16.gmra.mrb[24].mxu1 %v539_v58  ;;  %v523_v63 = vmax.f32 %v487_v60, 0.0  ;;  %v1623_v49 = vld [vmem:[#allocation8 + $0xe0] ss:$8 sps:$4 sm:$0xff]  }
 0x199   :  { %v493_v38 = vadd.f32 %v492_v62, %v1962_v50  ;;  %1448 = vmatpush1.bf16.msra.mxu1 %v1941_v42  ;;  %v524_v39 = vmax.f32 %v489_v61, 0.0  ;;  %1141 = vmatpush1.bf16.msra.mxu0 %v1623_v49  ;;  %v1628_v50 = vld [vmem:[#allocation8 + $0xf4] ss:$8 sps:$4 sm:$0xff]   ;;  %v1626_v42 = vld [vmem:[#allocation8 + $0xf0] ss:$8 sps:$4 sm:$0xff]  }
 0x19a   :  { %v525_v23 = vmax.f32 %v491_v37, 0.0  ;;  %1433 = vmatprep.subr.bf16.mxu1 %v1944_v43  ;;  %1142 = vmatprep.subr.bf16.mxu0 %v1628_v50  ;;  %v575_v43 = vld [vmem:[%s2121_s4] sm:$0x3] }
 0x19b   :  { %v526_v0 = vmax.f32 %v493_v38, 0.0  ;;  %v2030_v2 = vrot.slane %v575_v43, %v1955_v48 }
 0x19c   :  { %v541_v1 = vpack.c.bf16 %v525_v23, %v523_v63 }
 0x19d   :  { %v542_v40 = vpack.c.bf16 %v526_v0, %v524_v39  ;;  %1449 = vmatpush1.bf16.msra.mxu1 %v1947_v45  ;;  %1143 = vmatpush1.bf16.msra.mxu0 %v1626_v42  ;;  %v2027_v45 = vrot.slane %v575_v43, %v1950_v46 }
 0x19e   :  { %1434 = vmatprep.subr.bf16.mxu1 %v1625_v24 }
 0x19f   :  { %849 = vmatprep.mubr.bf16.mxu1 %v542_v40 }
 0x1a0   :  { %850 = vmatmul.mubr.bf16.gmra.mrb[28].mxu1 %v541_v1 }
 0x1a1   :  { %1450 = vmatpush1.bf16.msra.mxu1 %v1623_v49 }
 0x1a2   :  { %1435 = vmatprep.subr.bf16.mxu1 %v1628_v50 }
 0x1a5   :  { %1451 = vmatpush1.bf16.msra.mxu1 %v1626_v42 }
 0x23b   :  { %v781_v3 = vpop.f32.mrb[0].mxu1 }
 0x23c   :  { %v782_v4 = vadd.f32 %v781_v3, %v2027_v45  ;;  %v783_v5 = vpop.f32.mrb[1].mxu1 }
 0x23d   :  { %v784_v6 = vadd.f32 %v783_v5, %v2030_v2  ;;  %v785_v25 = vpop.f32.mrb[2].mxu1 }
 0x23e   :  { %v786_v7 = vadd.f32 %v785_v25, %v2027_v45  ;;  %v787_v26 = vpop.f32.mrb[3].mxu1  ;;  %v860_v9 = vmax.f32 %v782_v4, 0.0 }
 0x23f   :  { %v788_v8 = vadd.f32 %v787_v26, %v2030_v2  ;;  %v861_v10 = vmax.f32 %v784_v6, 0.0 }
 0x240   :  { %v862_v27 = vmax.f32 %v786_v7, 0.0 }
 0x241   :  { %v863_v11 = vmax.f32 %v788_v8, 0.0 }
 0x242   :  { %v892_v28 = vpack.c.bf16 %v862_v27, %v860_v9 }
 0x243   :  { %v893_v12 = vpack.c.bf16 %v863_v11, %v861_v10  ;;  %v791_v13 = vpop.f32.mrb[4].mxu1 }
 0x244   :  { %v792_v14 = vadd.f32 %v791_v13, %v2027_v45  ;;  %v793_v15 = vpop.f32.mrb[5].mxu1 }
 0x245   :  { %v794_v17 = vadd.f32 %v793_v15, %v2030_v2  ;;  %v795_v29 = vpop.f32.mrb[6].mxu1  ;;  %1144 = vmatprep.mubr.bf16.mxu0 %v893_v12 }
 0x246   :  { %v796_v41 = vadd.f32 %v795_v29, %v2027_v45  ;;  %v797_v30 = vpop.f32.mrb[7].mxu1  ;;  %1145 = vmatmul.mubr.bf16.vlgmr.msra.gmra.mrb[32].mxu0 %v892_v28  ;;  %v864_v47 = vmax.f32 %v792_v14, 0.0 }
 0x247   :  { %v798_v44 = vadd.f32 %v797_v30, %v2030_v2  ;;  %v865_v16 = vmax.f32 %v794_v17, 0.0 }
 0x248   :  { %v866_v31 = vmax.f32 %v796_v41, 0.0 }
 0x249   :  { %v867_v51 = vmax.f32 %v798_v44, 0.0 }
 0x24a   :  { %v894_v32 = vpack.c.bf16 %v866_v31, %v864_v47 }
 0x24b   :  { %v895_v18 = vpack.c.bf16 %v867_v51, %v865_v16  ;;  %v801_v52 = vpop.f32.mrb[8].mxu1 }
 0x24c   :  { %v802_v53 = vadd.f32 %v801_v52, %v2027_v45  ;;  %v803_v19 = vpop.f32.mrb[9].mxu1 }
 0x24d   :  { %v804_v54 = vadd.f32 %v803_v19, %v2030_v2  ;;  %v805_v33 = vpop.f32.mrb[10].mxu1  ;;  %1154 = vmatprep.mubr.bf16.mxu0 %v895_v18 }
 0x24e   :  { %v806_v55 = vadd.f32 %v805_v33, %v2027_v45  ;;  %v807_v34 = vpop.f32.mrb[11].mxu1  ;;  %1155 = vmatmul.mubr.bf16.gmra.mrb[36].mxu0 %v894_v32  ;;  %v868_v56 = vmax.f32 %v802_v53, 0.0 }
 0x24f   :  { %v808_v20 = vadd.f32 %v807_v34, %v2030_v2  ;;  %v869_v57 = vmax.f32 %v804_v54, 0.0 }
 0x250   :  { %v870_v35 = vmax.f32 %v806_v55, 0.0 }
 0x251   :  { %v871_v58 = vmax.f32 %v808_v20, 0.0 }
 0x252   :  { %v896_v36 = vpack.c.bf16 %v870_v35, %v868_v56 }
 0x253   :  { %v897_v59 = vpack.c.bf16 %v871_v58, %v869_v57  ;;  %v811_v60 = vpop.f32.mrb[12].mxu1 }
 0x254   :  { %v812_v21 = vadd.f32 %v811_v60, %v2027_v45  ;;  %v813_v61 = vpop.f32.mrb[13].mxu1 }
 0x255   :  { %v814_v22 = vadd.f32 %v813_v61, %v2030_v2  ;;  %v815_v37 = vpop.f32.mrb[14].mxu1  ;;  %1164 = vmatprep.mubr.bf16.mxu0 %v897_v59 }
 0x256   :  { %v816_v62 = vadd.f32 %v815_v37, %v2027_v45  ;;  %v817_v38 = vpop.f32.mrb[15].mxu1  ;;  %1165 = vmatmul.mubr.bf16.gmra.mrb[40].mxu0 %v896_v36  ;;  %v872_v23 = vmax.f32 %v812_v21, 0.0 }
 0x257   :  { %v818_v63 = vadd.f32 %v817_v38, %v2030_v2  ;;  %v873_v0 = vmax.f32 %v814_v22, 0.0 }
 0x258   :  { %v874_v39 = vmax.f32 %v816_v62, 0.0 }
 0x259   :  { %v875_v1 = vmax.f32 %v818_v63, 0.0 }
 0x25a   :  { %v898_v40 = vpack.c.bf16 %v874_v39, %v872_v23 }
 0x25b   :  { %v899_v24 = vpack.c.bf16 %v875_v1, %v873_v0  ;;  %v821_v49 = vpop.f32.mrb[16].mxu1  ;;  %v940_v0 = vld [vmem:[%s2123_s6] sm:$0x3]  ;;  %s1753_s6 = smov [#allocation10]  }
 0x25c   :  { %v822_v50 = vadd.f32 %v821_v49, %v2027_v45  ;;  %v823_v42 = vpop.f32.mrb[17].mxu1  ;;  %v2068_v1 = vrot.slane %v940_v0, %v1950_v46  ;;  %s1294_s28 = sshll.u32 %s1753_s6, 4  ;;  %s1295_s28 = int_to_ptr.vmem [resolvable:$true] %s1294_s28 }
 0x25d   :  { %v824_v43 = vadd.f32 %v823_v42, %v2030_v2  ;;  %v825_v3 = vpop.f32.mrb[18].mxu1  ;;  %1174 = vmatprep.mubr.bf16.mxu0 %v899_v24  ;;  %s1717_s29 = scalar_lea.vmem %s1295_s28, 4096  ;;  %p1722_p5 = scmp.lt.s32.totalorder %s1295_s28, %s1295_s28 }
 0x25e   :  { %v826_v4 = vadd.f32 %v825_v3, %v2027_v45  ;;  %v827_v5 = vpop.f32.mrb[19].mxu1  ;;  %1175 = vmatmul.mubr.bf16.gmra.mrb[44].mxu0 %v898_v40  ;;  %v876_v25 = vmax.f32 %v822_v50, 0.0  ;;  %p1718_p4 = scmp.ne.s32.totalorder %s1295_s28, %s1717_s29  ;;  %p1723_p6 = scmp.lt.s32.totalorder %s1717_s29, %s1717_s29 }
 0x25f   :  { %v828_v6 = vadd.f32 %v827_v5, %v2030_v2  ;;  %v877_v26 = vmax.f32 %v824_v43, 0.0 }
 0x260   :  { %v878_v7 = vmax.f32 %v826_v4, 0.0  ;;  %p1724_p7 = por %p1723_p6, %p1722_p5 }
 0x261   :  { %v879_v8 = vmax.f32 %v828_v6, 0.0 }
 0x262   :  { %v900_v9 = vpack.c.bf16 %v878_v7, %v876_v25  ;;  %p1725_p8 = pnand %p1724_p7, %p1718_p4 }
 0x263   :  { %v901_v27 = vpack.c.bf16 %v879_v8, %v877_v26  ;;  %v831_v10 = vpop.f32.mrb[20].mxu1 }
 0x264   :  { %v832_v11 = vadd.f32 %v831_v10, %v2027_v45  ;;  %v833_v28 = vpop.f32.mrb[21].mxu1 }
 0x265   :  { %v834_v12 = vadd.f32 %v833_v28, %v2030_v2  ;;  %v835_v13 = vpop.f32.mrb[22].mxu1  ;;  %1184 = vmatprep.mubr.bf16.mxu1 %v901_v27 }
 0x266   :  { %v836_v14 = vadd.f32 %v835_v13, %v2027_v45  ;;  %v837_v15 = vpop.f32.mrb[23].mxu1  ;;  %1185 = vmatmul.mubr.bf16.vlgmr.msra.gmra.mrb[32].mxu1 %v900_v9  ;;  %v880_v29 = vmax.f32 %v832_v11, 0.0 }
 0x267   :  { %v838_v17 = vadd.f32 %v837_v15, %v2030_v2  ;;  %v881_v30 = vmax.f32 %v834_v12, 0.0 }
 0x268   :  { %v882_v41 = vmax.f32 %v836_v14, 0.0 }
 0x269   :  { %v883_v44 = vmax.f32 %v838_v17, 0.0 }
 0x26a   :  { %v902_v47 = vpack.c.bf16 %v882_v41, %v880_v29 }
 0x26b   :  { %v903_v31 = vpack.c.bf16 %v883_v44, %v881_v30  ;;  %v841_v16 = vpop.f32.mrb[24].mxu1 }
 0x26c   :  { %v842_v51 = vadd.f32 %v841_v16, %v2027_v45  ;;  %v843_v32 = vpop.f32.mrb[25].mxu1 }
 0x26d   :  { %v844_v18 = vadd.f32 %v843_v32, %v2030_v2  ;;  %v845_v52 = vpop.f32.mrb[26].mxu1  ;;  %1194 = vmatprep.mubr.bf16.mxu1 %v903_v31 }
 0x26e   :  { %v846_v53 = vadd.f32 %v845_v52, %v2027_v45  ;;  %v847_v19 = vpop.f32.mrb[27].mxu1  ;;  %1195 = vmatmul.mubr.bf16.gmra.mrb[36].mxu1 %v902_v47  ;;  %v884_v33 = vmax.f32 %v842_v51, 0.0 }
 0x26f   :  { %v848_v54 = vadd.f32 %v847_v19, %v2030_v2  ;;  %v885_v34 = vmax.f32 %v844_v18, 0.0 }
 0x270   :  { %v886_v55 = vmax.f32 %v846_v53, 0.0 }
 0x271   :  { %v887_v20 = vmax.f32 %v848_v54, 0.0 }
 0x272   :  { %v904_v56 = vpack.c.bf16 %v886_v55, %v884_v33 }
 0x273   :  { %v905_v35 = vpack.c.bf16 %v887_v20, %v885_v34  ;;  %v851_v57 = vpop.f32.mrb[28].mxu1 }
 0x274   :  { %v852_v58 = vadd.f32 %v851_v57, %v2027_v45  ;;  %v853_v36 = vpop.f32.mrb[29].mxu1 }
 0x275   :  { %v854_v59 = vadd.f32 %v853_v36, %v2030_v2  ;;  %v855_v60 = vpop.f32.mrb[30].mxu1  ;;  %1204 = vmatprep.mubr.bf16.mxu1 %v905_v35 }
 0x276   :  { %v856_v21 = vadd.f32 %v855_v60, %v2027_v45  ;;  %v857_v61 = vpop.f32.mrb[31].mxu1  ;;  %1205 = vmatmul.mubr.bf16.gmra.mrb[40].mxu1 %v904_v56  ;;  %v888_v37 = vmax.f32 %v852_v58, 0.0  ;;  %v2071_v45 = vrot.slane %v940_v0, %v1955_v48 }
 0x277   :  { %v858_v22 = vadd.f32 %v857_v61, %v2030_v2  ;;  %v889_v38 = vmax.f32 %v854_v59, 0.0 }
 0x278   :  { %v890_v62 = vmax.f32 %v856_v21, 0.0 }
 0x279   :  { %v891_v63 = vmax.f32 %v858_v22, 0.0 }
 0x27a   :  { %v906_v23 = vpack.c.bf16 %v890_v62, %v888_v37 }
 0x27b   :  { %v907_v39 = vpack.c.bf16 %v891_v63, %v889_v38 }
 0x27d   :  { %1214 = vmatprep.mubr.bf16.mxu1 %v907_v39 }
 0x27e   :  { %1215 = vmatmul.mubr.bf16.gmra.mrb[44].mxu1 %v906_v23 }
 0x319   :  { %v1146_v40 = vpop.f32.mrb[32].mxu0 }
 0x31a   :  { %v1147_v2 = vadd.f32 %v1146_v40, %v2068_v1  ;;  %v1148_v24 = vpop.f32.mrb[33].mxu0 }
 0x31b   :  { %v1149_v49 = vadd.f32 %v1148_v24, %v2071_v45  ;;  %v1150_v50 = vpop.f32.mrb[34].mxu0 }
 0x31c   :  { %v1225_v42 = vmax.f32 %v1147_v2, 0.0  ;;  %v1151_v43 = vadd.f32 %v1150_v50, %v2068_v1  ;;  %v1152_v3 = vpop.f32.mrb[35].mxu0 }
 0x31d   :  { %v1226_v4 = vmax.f32 %v1149_v49, 0.0  ;;  %v1153_v5 = vadd.f32 %v1152_v3, %v2071_v45 }
 0x31e   :  { %1257 = vst [vmem:[#allocation10] sm:$0xff] %v1225_v42  ;;  %v1227_v46 = vmax.f32 %v1151_v43, 0.0 }
 0x31f   :  { %1258 = vst [vmem:[#allocation10 + $0x8] sm:$0xff] %v1226_v4  ;;  %v1228_v6 = vmax.f32 %v1153_v5, 0.0 }
 0x320   :  { %1259 = vst [vmem:[#allocation10 + $0x10] sm:$0xff] %v1227_v46 }
 0x321   :  { %1260 = vst [vmem:[#allocation10 + $0x18] sm:$0xff] %v1228_v6  ;;  %v1156_v48 = vpop.f32.mrb[36].mxu0 }
 0x322   :  { %v1157_v25 = vadd.f32 %v1156_v48, %v2068_v1  ;;  %v1158_v7 = vpop.f32.mrb[37].mxu0 }
 0x323   :  { %v1159_v26 = vadd.f32 %v1158_v7, %v2071_v45  ;;  %v1160_v8 = vpop.f32.mrb[38].mxu0 }
 0x324   :  { %v1229_v9 = vmax.f32 %v1157_v25, 0.0  ;;  %v1161_v27 = vadd.f32 %v1160_v8, %v2068_v1  ;;  %v1162_v10 = vpop.f32.mrb[39].mxu0 }
 0x325   :  { %v1230_v11 = vmax.f32 %v1159_v26, 0.0  ;;  %v1163_v28 = vadd.f32 %v1162_v10, %v2071_v45 }
 0x326   :  { %1261 = vst [vmem:[#allocation10 + $0x20] sm:$0xff] %v1229_v9  ;;  %v1231_v12 = vmax.f32 %v1161_v27, 0.0 }
 0x327   :  { %1262 = vst [vmem:[#allocation10 + $0x28] sm:$0xff] %v1230_v11  ;;  %v1232_v13 = vmax.f32 %v1163_v28, 0.0 }
 0x328   :  { %1263 = vst [vmem:[#allocation10 + $0x30] sm:$0xff] %v1231_v12 }
 0x329   :  { %1264 = vst [vmem:[#allocation10 + $0x38] sm:$0xff] %v1232_v13  ;;  %v1166_v14 = vpop.f32.mrb[40].mxu0 }
 0x32a   :  { %v1167_v15 = vadd.f32 %v1166_v14, %v2068_v1  ;;  %v1168_v17 = vpop.f32.mrb[41].mxu0 }
 0x32b   :  { %v1169_v29 = vadd.f32 %v1168_v17, %v2071_v45  ;;  %v1170_v41 = vpop.f32.mrb[42].mxu0 }
 0x32c   :  { %v1233_v30 = vmax.f32 %v1167_v15, 0.0  ;;  %v1171_v44 = vadd.f32 %v1170_v41, %v2068_v1  ;;  %v1172_v47 = vpop.f32.mrb[43].mxu0 }
 0x32d   :  { %v1234_v31 = vmax.f32 %v1169_v29, 0.0  ;;  %v1173_v16 = vadd.f32 %v1172_v47, %v2071_v45 }
 0x32e   :  { %1265 = vst [vmem:[#allocation10 + $0x40] sm:$0xff] %v1233_v30  ;;  %v1235_v51 = vmax.f32 %v1171_v44, 0.0 }
 0x32f   :  { %1266 = vst [vmem:[#allocation10 + $0x48] sm:$0xff] %v1234_v31  ;;  %v1236_v32 = vmax.f32 %v1173_v16, 0.0 }
 0x330   :  { %1267 = vst [vmem:[#allocation10 + $0x50] sm:$0xff] %v1235_v51 }
 0x331   :  { %1268 = vst [vmem:[#allocation10 + $0x58] sm:$0xff] %v1236_v32  ;;  %v1176_v18 = vpop.f32.mrb[44].mxu0 }
 0x332   :  { %v1177_v52 = vadd.f32 %v1176_v18, %v2068_v1  ;;  %v1178_v53 = vpop.f32.mrb[45].mxu0 }
 0x333   :  { %v1179_v19 = vadd.f32 %v1178_v53, %v2071_v45  ;;  %v1180_v54 = vpop.f32.mrb[46].mxu0 }
 0x334   :  { %v1237_v33 = vmax.f32 %v1177_v52, 0.0  ;;  %v1181_v55 = vadd.f32 %v1180_v54, %v2068_v1  ;;  %v1182_v34 = vpop.f32.mrb[47].mxu0 }
 0x335   :  { %v1238_v20 = vmax.f32 %v1179_v19, 0.0  ;;  %v1183_v56 = vadd.f32 %v1182_v34, %v2071_v45 }
 0x336   :  { %1269 = vst [vmem:[#allocation10 + $0x60] sm:$0xff] %v1237_v33  ;;  %v1239_v35 = vmax.f32 %v1181_v55, 0.0 }
 0x337   :  { %1270 = vst [vmem:[#allocation10 + $0x68] sm:$0xff] %v1238_v20  ;;  %v1240_v57 = vmax.f32 %v1183_v56, 0.0 }
 0x338   :  { %1271 = vst [vmem:[#allocation10 + $0x70] sm:$0xff] %v1239_v35 }
 0x339   :  { %1272 = vst [vmem:[#allocation10 + $0x78] sm:$0xff] %v1240_v57  ;;  %v1186_v58 = vpop.f32.mrb[32].mxu1 }
 0x33a   :  { %v1187_v36 = vadd.f32 %v1186_v58, %v2068_v1  ;;  %v1188_v59 = vpop.f32.mrb[33].mxu1 }
 0x33b   :  { %v1189_v60 = vadd.f32 %v1188_v59, %v2071_v45  ;;  %v1190_v21 = vpop.f32.mrb[34].mxu1 }
 0x33c   :  { %v1241_v61 = vmax.f32 %v1187_v36, 0.0  ;;  %v1191_v22 = vadd.f32 %v1190_v21, %v2068_v1  ;;  %v1192_v37 = vpop.f32.mrb[35].mxu1 }
 0x33d   :  { %v1242_v62 = vmax.f32 %v1189_v60, 0.0  ;;  %v1193_v38 = vadd.f32 %v1192_v37, %v2071_v45 }
 0x33e   :  { %1273 = vst [vmem:[#allocation10 + $0x80] sm:$0xff] %v1241_v61  ;;  %v1243_v63 = vmax.f32 %v1191_v22, 0.0 }
 0x33f   :  { %1274 = vst [vmem:[#allocation10 + $0x88] sm:$0xff] %v1242_v62  ;;  %v1244_v23 = vmax.f32 %v1193_v38, 0.0 }
 0x340   :  { %1275 = vst [vmem:[#allocation10 + $0x90] sm:$0xff] %v1243_v63 }
 0x341   :  { %1276 = vst [vmem:[#allocation10 + $0x98] sm:$0xff] %v1244_v23  ;;  %v1196_v39 = vpop.f32.mrb[36].mxu1 }
 0x342   :  { %v1197_v0 = vadd.f32 %v1196_v39, %v2068_v1  ;;  %v1198_v40 = vpop.f32.mrb[37].mxu1 }
 0x343   :  { %v1199_v2 = vadd.f32 %v1198_v40, %v2071_v45  ;;  %v1200_v24 = vpop.f32.mrb[38].mxu1 }
 0x344   :  { %v1245_v49 = vmax.f32 %v1197_v0, 0.0  ;;  %v1201_v50 = vadd.f32 %v1200_v24, %v2068_v1  ;;  %v1202_v42 = vpop.f32.mrb[39].mxu1 }
 0x345   :  { %v1246_v43 = vmax.f32 %v1199_v2, 0.0  ;;  %v1203_v3 = vadd.f32 %v1202_v42, %v2071_v45 }
 0x346   :  { %1277 = vst [vmem:[#allocation10 + $0xa0] sm:$0xff] %v1245_v49  ;;  %v1247_v4 = vmax.f32 %v1201_v50, 0.0 }
 0x347   :  { %1278 = vst [vmem:[#allocation10 + $0xa8] sm:$0xff] %v1246_v43  ;;  %v1248_v5 = vmax.f32 %v1203_v3, 0.0 }
 0x348   :  { %1279 = vst [vmem:[#allocation10 + $0xb0] sm:$0xff] %v1247_v4 }
 0x349   :  { %1280 = vst [vmem:[#allocation10 + $0xb8] sm:$0xff] %v1248_v5  ;;  %v1206_v46 = vpop.f32.mrb[40].mxu1 }
 0x34a   :  { %v1207_v6 = vadd.f32 %v1206_v46, %v2068_v1  ;;  %v1208_v48 = vpop.f32.mrb[41].mxu1 }
 0x34b   :  { %v1209_v25 = vadd.f32 %v1208_v48, %v2071_v45  ;;  %v1210_v7 = vpop.f32.mrb[42].mxu1 }
 0x34c   :  { %v1249_v26 = vmax.f32 %v1207_v6, 0.0  ;;  %v1211_v8 = vadd.f32 %v1210_v7, %v2068_v1  ;;  %v1212_v9 = vpop.f32.mrb[43].mxu1 }
 0x34d   :  { %v1250_v27 = vmax.f32 %v1209_v25, 0.0  ;;  %v1213_v10 = vadd.f32 %v1212_v9, %v2071_v45 }
 0x34e   :  { %1281 = vst [vmem:[#allocation10 + $0xc0] sm:$0xff] %v1249_v26  ;;  %v1251_v11 = vmax.f32 %v1211_v8, 0.0 }
 0x34f   :  { %1282 = vst [vmem:[#allocation10 + $0xc8] sm:$0xff] %v1250_v27  ;;  %v1252_v28 = vmax.f32 %v1213_v10, 0.0 }
 0x350   :  { %1283 = vst [vmem:[#allocation10 + $0xd0] sm:$0xff] %v1251_v11 }
 0x351   :  { %1284 = vst [vmem:[#allocation10 + $0xd8] sm:$0xff] %v1252_v28  ;;  %v1216_v12 = vpop.f32.mrb[44].mxu1 }
 0x352   :  { %v1217_v13 = vadd.f32 %v1216_v12, %v2068_v1  ;;  %v1218_v14 = vpop.f32.mrb[45].mxu1 }
 0x353   :  { %v1219_v15 = vadd.f32 %v1218_v14, %v2071_v45  ;;  %v1220_v17 = vpop.f32.mrb[46].mxu1 }
 0x354   :  { %v1253_v29 = vmax.f32 %v1217_v13, 0.0  ;;  %v1221_v41 = vadd.f32 %v1220_v17, %v2068_v1  ;;  %v1222_v30 = vpop.f32.mrb[47].mxu1 }
 0x355   :  { %v1254_v44 = vmax.f32 %v1219_v15, 0.0  ;;  %v1223_v47 = vadd.f32 %v1222_v30, %v2071_v45 }
 0x356   :  { %1285 = vst [vmem:[#allocation10 + $0xe0] sm:$0xff] %v1253_v29  ;;  %v1255_v31 = vmax.f32 %v1221_v41, 0.0 }
 0x357   :  { %1286 = vst [vmem:[#allocation10 + $0xe8] sm:$0xff] %v1254_v44  ;;  %v1256_v16 = vmax.f32 %v1223_v47, 0.0 }
 0x358   :  { %1287 = vst [vmem:[#allocation10 + $0xf0] sm:$0xff] %v1255_v31 }
 0x359   :  { %1288 = vst [vmem:[#allocation10 + $0xf8] sm:$0xff] %v1256_v16 }
 0x35a   :  { %1728 = shalt.err (!%p1725_p8)
}
 0x35b   :  { %s1729_s9 = scalar_lea.hbm %s2124_s7, 4096 }
 0x35c   :  { %p1730_p9 = scmp.ne.s32.totalorder %s2124_s7, %s1729_s9  ;;  %p1733_p10 = scmp.lt.u32.totalorder %s1729_s9, %s2124_s7 }
 0x35e   :  { %p1735_p11 = pnand %p1733_p10, %p1730_p9 }
 0x360   :  { %1738 = shalt.err (!%p1735_p11)
}
 0x361   :  { %s1754_s16 = smov 256   ;;  %s1755_s0 = smov 16  }
 0x362   :  { %1300 = dma.vmem_to_hbm [thread:$0]  %s1295_s28, 4096, %s2124_s7, [#allocation4], %s1754_s16, %s1754_s16, %s1755_s0  }
 0x363   :  { %1745 = dma.done.wait [#allocation4], 4096  }
 0x364   :  { %1746 = vsyncadd [#allocation4], 4294963200 }
 0x365   :  { %1304 = vsyncpa [#allocation3], 1 }
 0x366   :  { %1305 = vsyncpa [#allocation6], 1 }
 0x367   :  { %1306 = vsyncpa [#allocation9], 1 }
 0x368   :  { %1307 = vsyncpa [#allocation4], 1 }

</bundles_post_ra>
